<compile_context>
chip_gen: v5e
topology: v5e:2x2
jax: 0.10.0
libtpu: 0.0.40
codegen_flags: <defaults>
</compile_context>

<pallas_src>
import jax
import jax.numpy as jnp
from jax.experimental import pallas as pl
from jax.experimental.pallas import tpu as pltpu

EPS = 1e-5


def _fin2d_cyclic_kernel(cos_ref, sin_ref, p_ref, x_ref, o_ref):
    n = pl.program_id(0)

    x = x_ref[...].astype(jnp.float32)                  # (TC, HW), lane-dense
    inv_hw = jnp.float32(1.0 / x.shape[-1])

    # Single-pass statistics: two independent row reductions over the lane axis.
    s1 = jnp.sum(x, axis=-1, keepdims=True)             # (TC, 1)
    s2 = jnp.sum(x * x, axis=-1, keepdims=True)         # (TC, 1)
    mean = s1 * inv_hw
    var = jnp.maximum(s2 * inv_hw - mean * mean, 0.0)   # biased variance
    inv_std = jax.lax.rsqrt(var + EPS)                  # EUP slot (free-ish)

    # Cyclic FiLM parameters for this (sample, channel-tile).
    cos_n = cos_ref[n]                                  # SMEM scalar
    sin_n = sin_ref[n]
    p = p_ref[...].astype(jnp.float32)                  # (TC, 4) packed params
    gamma = p[:, 0:1] * cos_n + p[:, 1:2]               # (TC, 1)
    beta = p[:, 2:3] * sin_n + p[:, 3:4]                # (TC, 1)

    # Fold normalize + affine into one FMA pass over the tile.
    scale = gamma * inv_std                             # (TC, 1)
    shift = beta - mean * scale                         # (TC, 1)
    o_ref[...] = (x * scale + shift).astype(o_ref.dtype)


def _pick_channel_tile(C, row_bytes, target_bytes):
    """Largest channel tile that divides C, is a multiple of 8 (layout rule),
    and keeps one block under target_bytes.  Falls back to the full C."""
    if C * row_bytes <= target_bytes:
        return C
    best = None
    t = 8
    while t <= C and t * row_bytes <= target_bytes:
        if C % t == 0:
            best = t
        t += 8
    return best if best is not None else C


def fin2d_cyclic(x, cos, sin, a_gamma, b_gamma, a_beta, b_beta,
                 *, target_block_bytes=2 * 1024 * 1024):
    N, C, H, W = x.shape
    HW = H * W
    x2 = x.reshape(N, C, HW)                            # lane-dense layout

    # Pack the four per-channel parameter vectors into one (C, 4) array.
    params = jnp.stack(
        [a_gamma, b_gamma, a_beta, b_beta], axis=-1).astype(jnp.float32)

    TC = _pick_channel_tile(C, HW * x.dtype.itemsize, target_block_bytes)
    grid = (N, C // TC)

    smem_spec = pl.BlockSpec(memory_space=pltpu.MemorySpace.SMEM)
    x_spec = pl.BlockSpec((pl.Squeezed(), TC, HW), lambda n, c: (n, c, 0))
    p_spec = pl.BlockSpec((TC, 4), lambda n, c: (c, 0))
    o_spec = pl.BlockSpec((pl.Squeezed(), TC, HW), lambda n, c: (n, c, 0))

    out = pl.pallas_call(
        _fin2d_cyclic_kernel,
        out_shape=jax.ShapeDtypeStruct((N, C, HW), x.dtype),
        grid=grid,
        in_specs=[smem_spec, smem_spec, p_spec, x_spec],
        out_specs=o_spec,
        compiler_params=pltpu.CompilerParams(
            dimension_semantics=("parallel", "parallel")),
    )(cos.astype(jnp.float32), sin.astype(jnp.float32), params, x2)

    return out.reshape(N, C, H, W)


def fin2d_cyclic_ref(x, cos, sin, a_gamma, b_gamma, a_beta, b_beta):
    xf = x.astype(jnp.float32)
    mean = jnp.mean(xf, axis=(2, 3), keepdims=True)
    var = jnp.mean((xf - mean) ** 2, axis=(2, 3), keepdims=True)
    x_hat = (xf - mean) / jnp.sqrt(var + EPS)
    gamma = a_gamma[None, :] * cos[:, None] + b_gamma[None, :]   # (N, C)
    beta = a_beta[None, :] * sin[:, None] + b_beta[None, :]      # (N, C)
    return x_hat * gamma[:, :, None, None] + beta[:, :, None, None]


if __name__ == "__main__":
    N, C, H, W = 2, 4, 16, 16
    key = jax.random.PRNGKey(0)
    kx, kc, ks, k1, k2, k3, k4 = jax.random.split(key, 7)

    x = jax.random.normal(kx, (N, C, H, W), dtype=jnp.float32)
    cos = jnp.cos(jax.random.uniform(kc, (N,), dtype=jnp.float32) * 6.28)
    sin = jnp.sin(jax.random.uniform(ks, (N,), dtype=jnp.float32) * 6.28)

    # Module __init__ uses zeros/ones; use small random values instead so the
    # gamma/beta path is actually exercised (shapes match __init__).
    a_gamma = 0.1 * jax.random.normal(k1, (C,), dtype=jnp.float32)
    b_gamma = 1.0 + 0.1 * jax.random.normal(k2, (C,), dtype=jnp.float32)
    a_beta = 0.1 * jax.random.normal(k3, (C,), dtype=jnp.float32)
    b_beta = 0.1 * jax.random.normal(k4, (C,), dtype=jnp.float32)

    out = fin2d_cyclic(x, cos, sin, a_gamma, b_gamma, a_beta, b_beta)
    out = jax.block_until_ready(out)

    ref = fin2d_cyclic_ref(x, cos, sin, a_gamma, b_gamma, a_beta, b_beta)
    assert out.shape == (N, C, H, W)
    assert jnp.allclose(out, ref, atol=1e-5, rtol=1e-5), "mismatch vs reference"

    print("KERNEL_OK")
</pallas_src>

<mosaic_0001>
module attributes {stable_mosaic.version = 11 : i64} {
  func.func @_fin2d_cyclic_kernel(%arg0: i32, %arg1: i32, %arg2: memref<2xf32, #tpu.memory_space<smem>>, %arg3: memref<2xf32, #tpu.memory_space<smem>>, %arg4: memref<4x4xf32, #tpu.memory_space<vmem>>, %arg5: memref<1x4x256xf32, #tpu.memory_space<vmem>>, %arg6: memref<1x4x256xf32, #tpu.memory_space<vmem>>) attributes {dimension_semantics = [#tpu.dimension_semantics<parallel>, #tpu.dimension_semantics<parallel>], iteration_bounds = array<i64: 2, 1>, scalar_prefetch = 0 : i64, scratch_operands = 0 : i64, tpu.core_type = #tpu.core_type<tc>, window_params = [{transform_indices = @transform_0, window_bounds = array<i64: 2>}, {transform_indices = @transform_1, window_bounds = array<i64: 2>}, {transform_indices = @transform_2, window_bounds = array<i64: 4, 4>}, {transform_indices = @transform_3, window_bounds = array<i64: 1, 4, 256>}, {transform_indices = @transform_4, window_bounds = array<i64: 1, 4, 256>}]} {
    %c0 = arith.constant 0 : index
    %c0_0 = arith.constant 0 : index
    %c0_1 = arith.constant 0 : index
    %0 = vector.load %arg5[%c0, %c0_0, %c0_1] : memref<1x4x256xf32, #tpu.memory_space<vmem>>, vector<1x4x256xf32>
    %1 = vector.shape_cast %0 : vector<1x4x256xf32> to vector<4x256xf32>
    %cst = arith.constant dense<0.000000e+00> : vector<4xf32>
    %2 = vector.multi_reduction <add>, %1, %cst [1] : vector<4x256xf32> to vector<4xf32>
    %3 = vector.shape_cast %2 : vector<4xf32> to vector<4x1xf32>
    %4 = arith.mulf %1, %1 : vector<4x256xf32>
    %cst_2 = arith.constant dense<0.000000e+00> : vector<4xf32>
    %5 = vector.multi_reduction <add>, %4, %cst_2 [1] : vector<4x256xf32> to vector<4xf32>
    %6 = vector.shape_cast %5 : vector<4xf32> to vector<4x1xf32>
    %cst_3 = arith.constant 3.906250e-03 : f32
    %7 = vector.broadcast %cst_3 : f32 to vector<4x1xf32>
    %8 = arith.mulf %3, %7 : vector<4x1xf32>
    %cst_4 = arith.constant 3.906250e-03 : f32
    %9 = vector.broadcast %cst_4 : f32 to vector<4x1xf32>
    %10 = arith.mulf %6, %9 : vector<4x1xf32>
    %11 = arith.mulf %8, %8 : vector<4x1xf32>
    %12 = arith.subf %10, %11 : vector<4x1xf32>
    %cst_5 = arith.constant 0.000000e+00 : f32
    %13 = vector.broadcast %cst_5 : f32 to vector<4x1xf32>
    %14 = arith.maximumf %12, %13 : vector<4x1xf32>
    %cst_6 = arith.constant 9.99999974E-6 : f32
    %15 = vector.broadcast %cst_6 : f32 to vector<4x1xf32>
    %16 = arith.addf %14, %15 : vector<4x1xf32>
    %17 = math.rsqrt %16 : vector<4x1xf32>
    %18 = arith.index_cast %arg0 : i32 to index
    %19 = memref.load %arg2[%18] : memref<2xf32, #tpu.memory_space<smem>>
    %20 = arith.index_cast %arg0 : i32 to index
    %21 = memref.load %arg3[%20] : memref<2xf32, #tpu.memory_space<smem>>
    %c0_7 = arith.constant 0 : index
    %c0_8 = arith.constant 0 : index
    %22 = vector.load %arg4[%c0_7, %c0_8] : memref<4x4xf32, #tpu.memory_space<vmem>>, vector<4x4xf32>
    %23 = vector.extract_strided_slice %22 {offsets = [0, 0], sizes = [4, 1], strides = [1, 1]} : vector<4x4xf32> to vector<4x1xf32>
    %24 = vector.broadcast %19 : f32 to vector<4x1xf32>
    %25 = arith.mulf %23, %24 : vector<4x1xf32>
    %26 = vector.extract_strided_slice %22 {offsets = [0, 1], sizes = [4, 1], strides = [1, 1]} : vector<4x4xf32> to vector<4x1xf32>
    %27 = arith.addf %25, %26 : vector<4x1xf32>
    %28 = vector.extract_strided_slice %22 {offsets = [0, 2], sizes = [4, 1], strides = [1, 1]} : vector<4x4xf32> to vector<4x1xf32>
    %29 = vector.broadcast %21 : f32 to vector<4x1xf32>
    %30 = arith.mulf %28, %29 : vector<4x1xf32>
    %31 = vector.extract_strided_slice %22 {offsets = [0, 3], sizes = [4, 1], strides = [1, 1]} : vector<4x4xf32> to vector<4x1xf32>
    %32 = arith.addf %30, %31 : vector<4x1xf32>
    %33 = arith.mulf %27, %17 : vector<4x1xf32>
    %34 = arith.mulf %8, %33 : vector<4x1xf32>
    %35 = arith.subf %32, %34 : vector<4x1xf32>
    %36 = vector.broadcast %33 : vector<4x1xf32> to vector<4x256xf32>
    %37 = arith.mulf %1, %36 : vector<4x256xf32>
    %38 = vector.broadcast %35 : vector<4x1xf32> to vector<4x256xf32>
    %39 = arith.addf %37, %38 : vector<4x256xf32>
    %c0_9 = arith.constant 0 : index
    %c0_10 = arith.constant 0 : index
    %c0_11 = arith.constant 0 : index
    %40 = vector.load %arg6[%c0_9, %c0_10, %c0_11] : memref<1x4x256xf32, #tpu.memory_space<vmem>>, vector<1x4x256xf32>
    %41 = vector.shape_cast %40 : vector<1x4x256xf32> to vector<4x256xf32>
    %42 = vector.shape_cast %39 : vector<4x256xf32> to vector<1x4x256xf32>
    tpu.vector_store %arg6[%c0_9, %c0_10, %c0_11], %42 {strides = array<i32>} : memref<1x4x256xf32, #tpu.memory_space<vmem>>, vector<1x4x256xf32>,
    return
  }
  func.func @transform_0(%arg0: i32, %arg1: i32) -> i32 {
    %c0_i32 = arith.constant 0 : i32
    %c0_i32_0 = arith.constant 0 : i32
    return %c0_i32 : i32
  }
  func.func @transform_1(%arg0: i32, %arg1: i32) -> i32 {
    %c0_i32 = arith.constant 0 : i32
    %c0_i32_0 = arith.constant 0 : i32
    return %c0_i32 : i32
  }
  func.func @transform_2(%arg0: i32, %arg1: i32) -> (i32, i32) {
    %c0_i32 = arith.constant 0 : i32
    %c0_i32_0 = arith.constant 0 : i32
    return %arg1, %c0_i32 : i32, i32
  }
  func.func @transform_3(%arg0: i32, %arg1: i32) -> (i32, i32, i32) {
    %c0_i32 = arith.constant 0 : i32
    %c0_i32_0 = arith.constant 0 : i32
    return %arg0, %arg1, %c0_i32 : i32, i32, i32
  }
  func.func @transform_4(%arg0: i32, %arg1: i32) -> (i32, i32, i32) {
    %c0_i32 = arith.constant 0 : i32
    %c0_i32_0 = arith.constant 0 : i32
    return %arg0, %arg1, %c0_i32 : i32, i32, i32
  }
}

</mosaic_0001>

<bundles_post_ra>
// kernel: tpu_custom_call.1
= control target key start
LH: loop header
LB: loop body
LE: loop exit
PB: predicated region body
PF: predicated region fallthrough
CT: control target
= control target key end

     0   :  { %9 = vsyncpa [#allocation5], 0  ;;  %s1026_s0 = inlined_call_operand.hbm [shape: f32[2], index: 0, kind: input, shape index: {}]   ;;  %s1027_s1 = inlined_call_operand.hbm [shape: f32[2], index: 1, kind: input, shape index: {}]   ;;  %s1028_s2 = inlined_call_operand.hbm [shape: f32[4,4], index: 2, kind: input, shape index: {}]   ;;  %s1029_s3 = inlined_call_operand.hbm [shape: f32[2,4,256], index: 3, kind: input, shape index: {}]   ;;  %s1030_s4 = inlined_call_operand.hbm [shape: f32[2,4,256], index: 4, kind: output, shape index: {}]  }
   0x1   :  { %10 = vsyncpa [#allocation7], 0 }
   0x2   :  { %11 = vsyncpa [#allocation3], 0 }
   0x3   :  { %12 = vsyncpa [#allocation10], 0 }
   0x4   :  { %14 = vsyncpa [#allocation10 + $0x1], 0 }
   0x5   :  { %15 = vsyncpa [#allocation4], 0 }
   0x6   :  { %17 = vsyncpa [#allocation4 + $0x1], 0  ;;  %s849_s15 = smov 0   ;;  %s851_s16 = smov 0  }
   0x7   :  { %s853_s17 = smov 0   ;;  %s855_s18 = smov 0  }
   0x8   :  { %s857_s19 = smov 0   ;;  %s859_s20 = smov 0  }
   0x9 LB: > { %s504_s21 = sadd.s32 4294967295, %s814_s20   ;;  %s505_s22 = sadd.s32 4294967294, %s814_s20   ;;  %s814_s20 = sphi %s859_s20, %s23_s20   ;;  %s810_s19 = sphi %s857_s19, %s1042_s19   ;;  %s806_s18 = sphi %s855_s18, %s1041_s18   ;;  %s802_s17 = sphi %s853_s17, %s1040_s17   ;;  %s798_s16 = sphi %s851_s16, %s1039_s16   ;;  %s794_s15 = sphi %s849_s15, %s1038_s15  }
   0xa   : > { %p125_p0 = scmp.ne.s32.totalorder %s798_s16, %s794_s15  ;;  %p883_p1 = scmp.eq.s32.totalorder %s504_s21, 0 }
   0xb   : > { %p887_p2 = scmp.eq.s32.totalorder %s504_s21, 1  ;;  %p157_p3 = scmp.eq.s32.totalorder %s505_s22, 1 }
   0xc   : > { %p893_p4 = por %p883_p1, %p125_p0  ;;  %p506_p5 = scmp.ge.s32.totalorder %s814_s20, 1 }
   0xd   : > { %p898_p6 = por %p157_p3, %p125_p0  ;;  %p164_p7 = scmp.lt.s32.totalorder %s814_s20, 3 }
   0xe   : > { %s176_s29 = sshll.u32 %s1026_s0, 4  ;;  %p510_p9 = scmp.ge.s32.totalorder %s814_s20, 2  ;;  %s177_s29 = int_to_ptr.hbm [resolvable:$true] %s176_s29 }
   0xf   : > { %p906_p8 = pnand %p506_p5, %p164_p7  ;;  %s186_s7 = sshll.u32 %s1027_s1, 4  ;;  %s187_s7 = int_to_ptr.hbm [resolvable:$true] %s186_s7 }
  0x10   : > { %s198_s10 = sshll.u32 %s1028_s2, 4  ;;  %s816_s11 = smov [#allocation8]   ;;  %s199_s10 = int_to_ptr.hbm [resolvable:$true] %s198_s10 }
  0x11   : > { %p543_p10 = pneg %p906_p8  ;;  %s200_s12 = sshll.u32 %s816_s11, 4  ;;  %s201_s12 = int_to_ptr.vmem [resolvable:$true] %s200_s12 }
  0x12   : > { %s817_s13 = smov [#allocation2]   ;;  %s818_s14 = smov [#allocation6]  }
  0x13   : > { %p544_p11 = pnand %p543_p10, %p883_p1  ;;  %s112_s21 = sadd.s32 1, %s802_s17 }
  0x14   : > { %s35_s22 = sadd.s32 1, %s810_s19  ;;  %p119_p12 = scmp.ne.s32.totalorder %s802_s17, %s798_s16 }
  0x15   : > { %546 = dma.hbm_to_smem (!%p544_p11), %s177_s29, 16, %s817_s13, [#allocation5]  }
  0x16   : > { %549 = dma.hbm_to_smem (!%p544_p11), %s187_s7, 16, %s818_s14, [#allocation7]  }
  0x17   : > { %552 = dma.hbm_to_vmem [thread:$0]  (!%p544_p11), %s199_s10, 64, %s201_s12, [#allocation3]  }
  0x18   : > { %p37_p13 = scmp.ge.s32.totalorder %s35_s22, 2  ;;  %p120_p0 = scmp.eq.s32.totalorder %s814_s20, 0 }
  0x19   : > { %p928_p3 = por %p887_p2, %p119_p12  ;;  %p564_p5 = scmp.lt.s32.totalorder %s814_s20, 2 }
  0x1a   : > { %s1044_s22 = smov (%p37_p13, %s35_s22), 0  ;;  %p935_p7 = por %p120_p0, %p119_p12 }
  0x1b   : > { %s211_s29 = sand.u32 1, %s802_s17   ;;  %s107_s5 = ssub.s32 %s810_s19, %s1044_s22 }
  0x1c   : > { %p110_p10 = scmp.eq.s32.totalorder %s107_s5, 0  ;;  %s511_s6 = sshll.u32 %s211_s29, 3 }
  0x1d   : > { %s525_s7 = sshll.u32 %s810_s19, 3  ;;  %s215_s11 = scalar_lea.vmem [#allocation9], %s511_s6 }
  0x1e   : > { %s944_s24 = scalar_select %p110_p10, %s802_s17, %s112_s21  }
  0x1f   : > { %s222_s10 = scalar_lea.hbm %s1029_s3, %s525_s7  ;;  %s226_s12 = sshll.u32 %s215_s11, 4  ;;  %s227_s12 = int_to_ptr.vmem [resolvable:$true] %s226_s12 }
  0x20   : > { %s224_s13 = sshll.u32 %s222_s10, 4  ;;  %p554_p2 = pnand %p564_p5, %p935_p7  ;;  %s225_s13 = int_to_ptr.hbm [resolvable:$true] %s224_s13 }
  0x21   : > { %s212_s14 = scalar_lea.sflag [#allocation10], %s211_s29  ;;  %235 = sbr.rel (%p906_p8) target bundleno = 430 (0x1ae), region = 36 }
  0x22   : > { %556 = dma.hbm_to_vmem [thread:$0]  (!%p554_p2), %s225_s13, 128, %s227_s12, %s212_s14  }
  0x26   : > { %773 = dma.done.wait (%p883_p1), [#allocation5], 16  }
  0x27   : > { %775 = vsyncadd (%p883_p1), [#allocation5], 4294967280 }
  0x28   : > { %777 = dma.done.wait (%p883_p1), [#allocation7], 16  }
  0x29   : > { %779 = vsyncadd (%p883_p1), [#allocation7], 4294967280 }
  0x2a   : > { %781 = dma.done.wait (%p883_p1), [#allocation3], 64  }
  0x2b   : > { %783 = vsyncadd (%p883_p1), [#allocation3], 4294967232  ;;  %s968_s30 = sand.u32 1, %s798_s16  }
  0x2c   : > { %s518_s21 = sshll.u32 %s968_s30, 3  ;;  %s253_s28 = scalar_lea.sflag [#allocation10], %s968_s30 }
  0x2d   : > { %s256_s29 = scalar_lea.vmem [#allocation9], %s518_s21 }
  0x2e   : > { %785 = dma.done.wait (%p893_p4), %s253_s28, 128  }
  0x2f   : > { %787 = vsyncadd (%p893_p4), %s253_s28, 4294967168 }
  0x30   : > { %262 = sfence }
  0x31   : > { %v978_v0 = vld [vmem:[%s256_s29] sm:$0xff]  ;;  %v326_v1 = vld [vmem:[#allocation8] sm:$0xf]  ;;  %s819_s23 = smov 127   ;;  %vm290_vm0 = vcmask 1043456   ;;  %v820_v13 = vmov 0  }
  0x32   : > { %285 = vst [vmem:[#allocation1] ss:$2 sm:$0xff] %v978_v0  ;;  %330 = vrot.lane.b32.xlu1 %v326_v1, %s819_s23  ;;  %v296_v2 = vmul.f32 %v978_v0, %v978_v0  ;;  %625 = vset.pattern.permute.xlu2 %v820_v13  ;;  %s324_s25 = sld [smem:[#allocation2 + %s806_s18]]  ;;  %s821_s5 = smov 2   ;;  %v822_v35 = vmov 2  }
  0x33   : > { %627 = vset.pattern.permute.xlu0 %v822_v35  ;;  %s325_s6 = sld [smem:[#allocation6 + %s806_s18]]  ;;  %v823_v41 = vmov 839922192   ;;  %s526_s7 = sshll.u32 %s806_s18, 3 }
  0x34   : > { %v349_v42 = vunpack.c.l.s4 %v823_v41  ;;  %s379_s10 = scalar_lea.hbm %s1030_s4, %s526_s7  ;;  %s282_s11 = scalar_lea.vmem [#allocation11], %s518_s21 }
  0x35   : > { %s381_s12 = sshll.u32 %s282_s11, 4  ;;  %s383_s13 = sshll.u32 %s379_s10, 4  ;;  %s382_s12 = int_to_ptr.vmem [resolvable:$true] %s381_s12  ;;  %s384_s13 = int_to_ptr.hbm [resolvable:$true] %s383_s13 }
  0x36   : > { %v350_v44 = vunpack.c.0.s8 %v349_v42  ;;  %s366_s14 = scalar_lea.sflag [#allocation4], %s968_s30  ;;  %s734_s18 = sshra.s32 %s384_s13, 4  ;;  %s735_s18 = int_to_ptr.hbm [resolvable:$true] %s734_s18 }
  0x37   : > { %s736_s28 = scalar_lea.hbm %s735_s18, 8  ;;  %s740_s21 = scalar_lea.hbm %s1030_s4, 16 }
  0x38   : > { %v327_v24 = vstv %s324_s25  ;;  %p737_p1 = scmp.ne.s32.totalorder %s735_s18, %s736_s28  ;;  %p741_p11 = scmp.lt.s32.totalorder %s735_s18, %s1030_s4 }
  0x39   : > { %v286_v3 = vld.sshfl [vmem:[#allocation1] sm:$0xff pattern:$0x75316420]  ;;  %v287_v4 = vld.sshfl [vmem:[#allocation1 + $0x8] sm:$0xff pattern:$0x75316420]  ;;  %v328_v26 = vmul.f32 %v327_v24, %v326_v1  ;;  %v334_v36 = vstv %s325_s6  ;;  %p742_p12 = scmp.lt.s32.totalorder %s740_s21, %s736_s28 }
  0x3a   : > { %v291_v5 = vsel %vm290_vm0, %v286_v3, 0.0  ;;  %v292_v6 = vsel %vm290_vm0, %v287_v4, 0.0  ;;  %298 = vst [vmem:[#allocation1] ss:$2 sm:$0xff] %v296_v2  ;;  %v335_v37 = vmul.f32 %v334_v36, %v326_v1  ;;  %p738_p4 = pnand %p737_p1, %p928_p3 }
  0x3b   : > { %v293_v7 = vadd.f32 %v292_v6, %v291_v5  ;;  %p743_p13 = por %p742_p12, %p741_p11 }
  0x3c   : > { %p739_p8 = pneg %p738_p4 }
  0x3d   : > { %294 = vadd.xlane.f32.xlu0 %v293_v7 }
  0x3e   : > { %p744_p0 = pnand %p743_p13, %p739_p8 }
  0x41   : > { %v299_v8 = vld.sshfl [vmem:[#allocation1] sm:$0xff pattern:$0x75316420]  ;;  %v300_v9 = vld.sshfl [vmem:[#allocation1 + $0x8] sm:$0xff pattern:$0x75316420] }
  0x42   : > { %v303_v10 = vsel %vm290_vm0, %v299_v8, 0.0  ;;  %v304_v11 = vsel %vm290_vm0, %v300_v9, 0.0 }
  0x43   : > { %v305_v12 = vadd.f32 %v304_v11, %v303_v10 }
  0x45   : > { %306 = vadd.xlane.f32.xlu0 %v305_v12 }
  0xa4   : > { %v331_v27 = vpop.permute.xlu1 %330 }
  0xa5   : > { %v333_v30 = vadd.f32 %v331_v27, %v328_v26  ;;  %v336_v38 = vadd.f32 %v335_v37, %v331_v27 }
  0xb0   : > { %v295_v14 = vpop.xlane.xlu0 %294 }
  0xb1   : > { %v308_v15 = vmul.f32 0.00390625, %v295_v14 }
  0xb3   : > { %v310_v17 = vmul.f32 %v308_v15, %v308_v15 }
  0xb8   : > { %v307_v16 = vpop.xlane.xlu0 %306 }
  0xb9   : > { %v309_v18 = vmul.f32 0.00390625, %v307_v16 }
  0xbb   : > { %v311_v19 = vsub.f32 %v309_v18, %v310_v17 }
  0xbd   : > { %v312_v20 = vmax.f32 %v311_v19, 0.0 }
  0xbf   : > { %v313_v21 = vadd.f32 1e-05, %v312_v20 }
  0xc1   : > { %628 = vrsqrt.f32 %v313_v21  ;;  %vm320_vm2 = vweird.f32 %v313_v21 }
  0xc7   : > { %v629_v22 = vpop.eup %628 }
  0xc8   : > { %v315_v23 = vmul.f32 %v629_v22, %v313_v21  ;;  %vm321_vm1 = vweird.f32 %v629_v22 }
  0xc9   : > { %vm322_vm3 = vmor %vm320_vm2, %vm321_vm1 }
  0xca   : > { %v316_v25 = vmul.f32 %v629_v22, %v315_v23 }
  0xcc   : > { %v317_v28 = vmul.f32 0.5, %v316_v25 }
  0xce   : > { %v318_v29 = vsub.f32 1.5, %v317_v28 }
  0xd0   : > { %v319_v31 = vmul.f32 %v629_v22, %v318_v29 }
  0xd2   : > { %v323_v32 = vsel %vm322_vm3, %v629_v22, %v319_v31 }
  0xd3   : > { %v337_v33 = vmul.f32 %v333_v30, %v323_v32 }
  0xd5   : > { %346 = vperm.xlu2 %625, %v337_v33   ;;  %v338_v34 = vmul.f32 %v337_v33, %v308_v15 }
  0xd7   : > { %340 = vrot.lane.b32.xlu1 %v338_v34, %s821_s5 }
  0xdd   : > { %626 = vset.pattern.permute.xlu2 %v822_v35 }
 0x12f   : > { %v347_v43 = vpop.permute.xlu2 %346 }
 0x130   : > { %v351_v45 = vperm.slane %v347_v43, %v350_v44 }
 0x132   : > { %v353_v47 = vmul.f32 %v351_v45, %v978_v0 }
 0x149   : > { %v341_v39 = vpop.permute.xlu1 %340 }
 0x14a   : > { %v343_v40 = vsub.f32 %v336_v38, %v341_v39 }
 0x14c   : > { %356 = vperm.xlu2 %626, %v343_v40  }
 0x1a6   : > { %v357_v46 = vpop.permute.xlu2 %356 }
 0x1a7   : > { %v361_v48 = vperm.slane %v357_v46, %v350_v44 }
 0x1a9   : > { %v363_v49 = vadd.f32 %v361_v48, %v353_v47 }
 0x1ab   : > { %364 = vst [vmem:[%s282_s11] sm:$0xff] %v363_v49 }
 0x1ac   : > { %747 = shalt.err (!%p744_p0)
}
 0x1ad   : > { %541 = dma.vmem_to_hbm [thread:$0]  (%p928_p3), %s382_s12, 128, %s384_s13, %s366_s14  }
 0x1ae PF: > { %s395_s30 = sand.u32 1, %s794_s15   ;;  %p558_p5 = pnand %p510_p9, %p898_p6 }
 0x1af   : > { %s396_s6 = scalar_lea.sflag [#allocation4], %s395_s30 }
 0x1b0   : > { %p559_p7 = pneg %p558_p5 }
 0x1b2   : > { %789 = dma.done.wait (%p559_p7), %s396_s6, 128  }
 0x1b3   : > { %791 = vsyncadd (%p559_p7), %s396_s6, 4294967168  ;;  %s23_s20 = sadd.s32 1, %s814_s20   ;;  %s1038_s15 = smov %s798_s16 }
 0x1b4   : > { %p20_p10 = scmp.ge.s32.totalorder %s23_s20, 4   ;;  %s1039_s16 = smov %s802_s17 }
 0x1b5   : > { %s1040_s17 = smov %s944_s24  ;;  %s1041_s18 = smov %s810_s19 }
 0x1b6   : > { %s1042_s19 = smov %s1044_s22  ;;  %22 = sbr.rel (!%p20_p10) target bundleno = 9 (0x9), region = 96 }
 0x1bb   :  { %402 = vsyncpa [#allocation3], 1 }
 0x1bc   :  { %404 = vsyncpa [#allocation3 + $0x1], 1 }
 0x1bd   :  { %405 = vsyncpa [#allocation10], 1 }
 0x1be   :  { %407 = vsyncpa [#allocation10 + $0x1], 1 }
 0x1bf   :  { %408 = vsyncpa [#allocation4], 1 }
 0x1c0   :  { %410 = vsyncpa [#allocation4 + $0x1], 1 }
 0x1c1   :  { %411 = vsyncpa [#allocation5], 1 }
 0x1c2   :  { %413 = vsyncpa [#allocation5 + $0x1], 1 }
 0x1c3   :  { %414 = vsyncpa [#allocation7], 1 }

</bundles_post_ra>
